<compile_context>
chip_gen: v7x
topology: tpu7x:2x2x1
jax: 0.10.0
libtpu: 0.0.40
codegen_flags: <defaults>
</compile_context>

<pallas_src>
import functools
import math

import jax
import jax.numpy as jnp
from jax.experimental import pallas as pl
from jax.experimental.pallas import tpu as pltpu


def _vmem_budgets():
    """(vmem_limit_bytes, per-block byte budget) tuned to the local chip.

    v5e/v6e have 128 MiB VMEM/core, v7x only 64 MiB.  Falls back to the
    conservative 64 MiB assumption if the query is unavailable."""
    try:
        cap = int(pltpu.get_tpu_info().vmem_capacity_bytes)
    except Exception:  # non-TPU backend / older jax — be conservative.
        cap = 64 * 1024 * 1024
    vmem_limit = min((cap // 4) * 3, 96 * 1024 * 1024)
    # Live VMEM ~= (1 in + 1 out) x double-buffer + ~4 block-sized roll temps
    # inside the kernel  =>  keep ~12 block-sized buffers under the limit.
    block_budget = max(128 * 1024, vmem_limit // 12)
    return vmem_limit, block_budget


def _roll(a, shift, axis):
    """Circular roll, jnp.roll semantics: out[i] = a[(i - shift) mod size]."""
    size = a.shape[axis]
    shift = shift % size
    if shift == 0:
        return a
    if (a.ndim == 2 and axis == a.ndim - 1 and size % 128 == 0
            and a.dtype.itemsize == 4):
        # Lane-aligned 32-bit case: XLU rotate (separate VLIW slot, effectively
        # free on the HBM-bound critical path).
        return pltpu.roll(a, shift, axis=axis)
    # General fallback: static slice + concat (always lowers; cost hidden by HBM).
    hi = jax.lax.slice_in_dim(a, size - shift, size, axis=axis)
    lo = jax.lax.slice_in_dim(a, 0, size - shift, axis=axis)
    return jnp.concatenate([hi, lo], axis=axis)


def _atom_ext_kernel(x_ref, o_ref, *, ps, nch, target, roll_lane, shift):
    """One tile of butterfly -> shift -> butterfly /2, entirely in lane space.

    The last axis of the tile is W*C (lane-interleaved channels): lane l holds
    (w = l // nch, c = l % nch).  Sum channels are c < ps, diff channels c >= ps.
    """
    x = x_ref[...]
    nd = x.ndim
    lane_axis = nd - 1
    lanes = x.shape[lane_axis]

    mask_shape = (1,) * (nd - 1) + (lanes,)
    lane_idx = jax.lax.broadcasted_iota(jnp.int32, mask_shape, lane_axis)
    sum_mask = (lane_idx % nch) < ps
    tgt_mask = sum_mask if target == 1 else jnp.logical_not(sum_mask)

    def butterfly(a):
        # Partner channel within the same spatial position (same C-lane group);
        # the circular wrap of the roll never reaches a lane that is used.
        diff_part = _roll(a, -ps, lane_axis)   # a[l + ps]  (used at sum lanes)
        sum_part = _roll(a, ps, lane_axis)     # a[l - ps]  (used at diff lanes)
        return jnp.where(sum_mask, a + diff_part, sum_part - a)

    b1 = butterfly(x)
    # Block shift of the target half: lane roll by +/-nch (Right/Left) or
    # sublane roll by +/-1 along full-extent H (Down/Up).
    axis = lane_axis if roll_lane else nd - 2
    b2 = jnp.where(tgt_mask, _roll(b1, shift, axis), b1)
    o_ref[...] = (butterfly(b2) * 0.5).astype(o_ref.dtype)


@functools.partial(
    jax.jit, static_argnames=("ps", "target", "direction", "block_budget"))
def _nsolt_atom_extension_2d(x, *, ps, target, direction, block_budget=None):
    n, h, w, c = x.shape
    nch = c
    lanes_total = w * nch
    itemsize = x.dtype.itemsize
    vmem_limit, auto_budget = _vmem_budgets()
    budget = block_budget if block_budget is not None else auto_budget
    sub_unit = max(8, 32 // itemsize)          # packed-sublane multiple per dtype

    cost = pl.CostEstimate(flops=6 * x.size, transcendentals=0,
                           bytes_accessed=2 * x.size * itemsize)

    if direction in ("Right", "Left"):
        # Roll along W: rows (n, h) are independent, so collapse them into one
        # flat grid axis (also keeps the parallel extent large for 2-TC v7x).
        shift = nch if direction == "Right" else -nch
        rows = n * h
        xr = x.reshape(rows, lanes_total)
        row_bytes = lanes_total * itemsize
        tr = max(sub_unit, (budget // max(1, row_bytes)) // sub_unit * sub_unit)
        if tr >= rows:
            tr = rows                          # block dim == full dim is legal
        grid = (pl.cdiv(rows, tr),)            # partial trailing tile is masked
        spec = pl.BlockSpec((tr, lanes_total), lambda i: (i, 0))
        kernel = functools.partial(_atom_ext_kernel, ps=ps, nch=nch,
                                   target=target, roll_lane=True, shift=shift)
        out = pl.pallas_call(
            kernel,
            out_shape=jax.ShapeDtypeStruct((rows, lanes_total), x.dtype),
            grid=grid,
            in_specs=[spec],
            out_specs=spec,
            compiler_params=pltpu.CompilerParams(
                dimension_semantics=("parallel",),
                vmem_limit_bytes=vmem_limit),
            cost_estimate=cost,
        )(xr)
        return out.reshape(n, h, w, c)

    # Down / Up: roll along H (sublanes).  H stays full-extent in the block so
    # the circular roll is in-block; the lane axis (W*C) is tiled in multiples
    # of lcm(128, C) when large (tile boundaries stay C-aligned so the
    # butterfly rolls never cross them at used lanes), and several samples are
    # packed per block when the per-sample plane is small.
    shift = 1 if direction == "Down" else -1
    xr = x.reshape(n, h, lanes_total)
    m = (128 * nch) // math.gcd(128, nch)      # lcm(128, nch)
    lane_budget = budget // max(1, h * itemsize)
    if lanes_total <= max(m, lane_budget):
        tl = lanes_total
    else:
        tl = max(m, (lane_budget // m) * m)
    if tl >= lanes_total:
        tl = lanes_total
    if tl == lanes_total:
        pb = max(1, min(n, budget // max(1, h * lanes_total * itemsize)))
    else:
        pb = 1
    grid = (pl.cdiv(n, pb), pl.cdiv(lanes_total, tl))
    if pb == 1:
        block_shape = (None, h, tl)            # squeezed sample dim -> 2-D tile
    else:
        block_shape = (pb, h, tl)
    spec = pl.BlockSpec(block_shape, lambda i, j: (i, 0, j))
    kernel = functools.partial(_atom_ext_kernel, ps=ps, nch=nch, target=target,
                               roll_lane=False, shift=shift)
    out = pl.pallas_call(
        kernel,
        out_shape=jax.ShapeDtypeStruct((n, h, lanes_total), x.dtype),
        grid=grid,
        in_specs=[spec],
        out_specs=spec,
        compiler_params=pltpu.CompilerParams(
            dimension_semantics=("parallel", "parallel"),
            vmem_limit_bytes=vmem_limit),
        cost_estimate=cost,
    )(xr)
    return out.reshape(n, h, w, c)


class NsoltAtomExtension2dLayer:
    """JAX/Pallas equivalent of the PyTorch NsoltAtomExtension2dLayer (forward only)."""

    def __init__(self, name='', number_of_channels=(), direction='', target_channels=''):
        if target_channels not in ('Sum', 'Difference'):
            raise ValueError('Target should be either of Sum or Difference')
        if direction not in ('Right', 'Left', 'Down', 'Up'):
            raise ValueError('Direction should be either of Right, Left, Down or Up')
        self.name = name
        self.number_of_channels = tuple(number_of_channels)
        self.direction = direction
        self.target_channels = target_channels
        self.description = (direction + ' shift the ' + target_channels.lower()
                            + '-channel Coefs. (ps,pa) = ('
                            + str(number_of_channels[0]) + ','
                            + str(number_of_channels[1]) + ')')
        # target: 0 -> 'Difference' half shifted, 1 -> 'Sum' half shifted
        self._target = 0 if target_channels == 'Difference' else 1

    def __call__(self, x):
        ps, pa = self.number_of_channels
        n, h, w, c = x.shape
        assert ps == pa and ps + pa == c, "requires ps == pa and ps + pa == nChsTotal"
        return _nsolt_atom_extension_2d(x, ps=ps, target=self._target,
                                        direction=self.direction)

    forward = __call__


def _reference(x, ps, target, direction):
    """Pure-JAX reference mirroring the PyTorch forward."""
    def butterfly(a):
        s, d = a[..., :ps], a[..., ps:]
        return jnp.concatenate([s + d, s - d], axis=-1)

    shifts = {'Right': (0, 0, 1, 0), 'Left': (0, 0, -1, 0),
              'Down': (0, 1, 0, 0), 'Up': (0, -1, 0, 0)}[direction]
    y = butterfly(x)
    if target == 0:
        y = y.at[..., ps:].set(jnp.roll(y[..., ps:], shifts, axis=(0, 1, 2, 3)))
    else:
        y = y.at[..., :ps].set(jnp.roll(y[..., :ps], shifts, axis=(0, 1, 2, 3)))
    return butterfly(y) / 2.0


if __name__ == "__main__":
    key = jax.random.PRNGKey(0)
    ps, pa = 2, 2
    C = ps + pa

    def run_check(x, direction, target_channels, block_budget=None, tol=1e-5):
        target = 0 if target_channels == 'Difference' else 1
        if block_budget is None:
            layer = NsoltAtomExtension2dLayer(
                name="Qn", number_of_channels=(ps, pa),
                direction=direction, target_channels=target_channels)
            out = layer(x)
        else:
            out = _nsolt_atom_extension_2d(x, ps=ps, target=target,
                                           direction=direction,
                                           block_budget=block_budget)
        out = jax.block_until_ready(out)
        ref = _reference(x, ps, target, direction)
        assert out.shape == x.shape and out.dtype == x.dtype
        ok = jnp.allclose(out.astype(jnp.float32), ref.astype(jnp.float32),
                          atol=tol, rtol=tol)
        assert bool(ok), (f"mismatch {direction}/{target_channels} "
                          f"shape={x.shape} dtype={x.dtype}")

    # 1) Every direction x target at a small, lane-unaligned shape (W*C = 64).
    for direction in ('Right', 'Left', 'Down', 'Up'):
        for target_channels in ('Difference', 'Sum'):
            key, sub = jax.random.split(key)
            x = jax.random.normal(sub, (2, 8, 16, C), dtype=jnp.float32)
            run_check(x, direction, target_channels)

    # 2) Lane-aligned shapes (W*C = 128) exercising the pltpu.roll (XLU) path
    #    and the squeezed-sample (2-D tile) Down/Up path.
    for (shape, direction, target_channels) in [
            ((2, 8, 32, C), 'Right', 'Difference'),
            ((2, 8, 32, C), 'Left', 'Sum'),
            ((1, 8, 32, C), 'Down', 'Sum'),
            ((1, 8, 32, C), 'Up', 'Difference')]:
        key, sub = jax.random.split(key)
        x = jax.random.normal(sub, shape, dtype=jnp.float32)
        run_check(x, direction, target_channels)

    # 3) bfloat16 (native low-precision compute inside the kernel).
    key, sub = jax.random.split(key)
    xb = jax.random.normal(sub, (2, 8, 32, C), dtype=jnp.float32).astype(jnp.bfloat16)
    run_check(xb, 'Right', 'Sum', tol=2e-2)

    # 4) Tiling stress: a tiny block budget forces partial row tiles (Right/Left)
    #    and lane tiling with a partial trailing lane tile (Down/Up).
    key, sub = jax.random.split(key)
    xs = jax.random.normal(sub, (2, 44, 24, C), dtype=jnp.float32)  # rows=88, tr=40
    run_check(xs, 'Left', 'Difference', block_budget=16 * 1024)
    key, sub = jax.random.split(key)
    xs = jax.random.normal(sub, (2, 32, 72, C), dtype=jnp.float32)  # L=288, tl=128
    run_check(xs, 'Down', 'Difference', block_budget=16 * 1024)
    run_check(xs, 'Up', 'Sum', block_budget=16 * 1024)

    print("KERNEL_OK")
</pallas_src>

<mosaic_0001>
module attributes {stable_mosaic.version = 11 : i64} {
  func.func @_atom_ext_kernel(%arg0: i32, %arg1: memref<16x64xf32, #tpu.memory_space<vmem>>, %arg2: memref<16x64xf32, #tpu.memory_space<vmem>>) attributes {dimension_semantics = [#tpu.dimension_semantics<parallel>], iteration_bounds = array<i64: 1>, scalar_prefetch = 0 : i64, scratch_operands = 0 : i64, tpu.core_type = #tpu.core_type<tc>, window_params = [{transform_indices = @transform_0, window_bounds = array<i64: 16, 64>}, {transform_indices = @transform_1, window_bounds = array<i64: 16, 64>}]} {
    %c0 = arith.constant 0 : index
    %c0_0 = arith.constant 0 : index
    %0 = vector.load %arg1[%c0, %c0_0] : memref<16x64xf32, #tpu.memory_space<vmem>>, vector<16x64xf32>
    %1 = tpu.iota {dimensions = array<i32: 1>} : vector<1x64xi32>
    %c4_i32 = arith.constant 4 : i32
    %c0_i32 = arith.constant 0 : i32
    %2 = arith.cmpi eq, %c4_i32, %c0_i32 : i32
    %c1_i32 = arith.constant 1 : i32
    %3 = arith.select %2, %c1_i32, %c4_i32 : i32
    %4 = vector.broadcast %3 : i32 to vector<1x64xi32>
    %5 = arith.remsi %1, %4 : vector<1x64xi32>
    %c0_i32_1 = arith.constant 0 : i32
    %6 = vector.broadcast %c0_i32_1 : i32 to vector<1x64xi32>
    %7 = arith.cmpi ne, %5, %6 : vector<1x64xi32>
    %c0_i32_2 = arith.constant 0 : i32
    %8 = vector.broadcast %c0_i32_2 : i32 to vector<1x64xi32>
    %9 = arith.cmpi slt, %5, %8 : vector<1x64xi32>
    %c0_i32_3 = arith.constant 0 : i32
    %10 = arith.cmpi slt, %3, %c0_i32_3 : i32
    %11 = vector.broadcast %10 : i1 to vector<1x64xi1>
    %12 = vector.broadcast %11 : vector<1x64xi1> to vector<1x64xi1>
    %13 = arith.xori %9, %12 : vector<1x64xi1>
    %14 = arith.andi %13, %7 : vector<1x64xi1>
    %15 = vector.broadcast %3 : i32 to vector<1x64xi32>
    %16 = arith.addi %5, %15 : vector<1x64xi32>
    %17 = arith.select %14, %16, %5 : vector<1x64xi1>, vector<1x64xi32>
    %c2_i32 = arith.constant 2 : i32
    %18 = vector.broadcast %c2_i32 : i32 to vector<1x64xi32>
    %19 = arith.cmpi slt, %17, %18 : vector<1x64xi32>
    %cst = arith.constant dense<true> : vector<1x64xi1>
    %20 = arith.xori %19, %cst : vector<1x64xi1>
    %21 = vector.extract_strided_slice %0 {offsets = [0, 2], sizes = [16, 62], strides = [1, 1]} : vector<16x64xf32> to vector<16x62xf32>
    %22 = vector.extract_strided_slice %0 {offsets = [0, 0], sizes = [16, 2], strides = [1, 1]} : vector<16x64xf32> to vector<16x2xf32>
    %23 = tpu.concatenate %21, %22 in 1 : vector<16x62xf32>, vector<16x2xf32> -> vector<16x64xf32>
    %24 = vector.extract_strided_slice %0 {offsets = [0, 62], sizes = [16, 2], strides = [1, 1]} : vector<16x64xf32> to vector<16x2xf32>
    %25 = vector.extract_strided_slice %0 {offsets = [0, 0], sizes = [16, 62], strides = [1, 1]} : vector<16x64xf32> to vector<16x62xf32>
    %26 = tpu.concatenate %24, %25 in 1 : vector<16x2xf32>, vector<16x62xf32> -> vector<16x64xf32>
    %27 = arith.addf %0, %23 : vector<16x64xf32>
    %28 = arith.subf %26, %0 : vector<16x64xf32>
    %29 = vector.shape_cast %19 : vector<1x64xi1> to vector<1x64xi1>
    %30 = vector.broadcast %29 : vector<1x64xi1> to vector<16x64xi1>
    %31 = arith.select %30, %27, %28 : vector<16x64xi1>, vector<16x64xf32>
    %32 = vector.extract_strided_slice %31 {offsets = [0, 60], sizes = [16, 4], strides = [1, 1]} : vector<16x64xf32> to vector<16x4xf32>
    %33 = vector.extract_strided_slice %31 {offsets = [0, 0], sizes = [16, 60], strides = [1, 1]} : vector<16x64xf32> to vector<16x60xf32>
    %34 = tpu.concatenate %32, %33 in 1 : vector<16x4xf32>, vector<16x60xf32> -> vector<16x64xf32>
    %35 = vector.shape_cast %20 : vector<1x64xi1> to vector<1x64xi1>
    %36 = vector.broadcast %35 : vector<1x64xi1> to vector<16x64xi1>
    %37 = arith.select %36, %34, %31 : vector<16x64xi1>, vector<16x64xf32>
    %38 = vector.extract_strided_slice %37 {offsets = [0, 2], sizes = [16, 62], strides = [1, 1]} : vector<16x64xf32> to vector<16x62xf32>
    %39 = vector.extract_strided_slice %37 {offsets = [0, 0], sizes = [16, 2], strides = [1, 1]} : vector<16x64xf32> to vector<16x2xf32>
    %40 = tpu.concatenate %38, %39 in 1 : vector<16x62xf32>, vector<16x2xf32> -> vector<16x64xf32>
    %41 = vector.extract_strided_slice %37 {offsets = [0, 62], sizes = [16, 2], strides = [1, 1]} : vector<16x64xf32> to vector<16x2xf32>
    %42 = vector.extract_strided_slice %37 {offsets = [0, 0], sizes = [16, 62], strides = [1, 1]} : vector<16x64xf32> to vector<16x62xf32>
    %43 = tpu.concatenate %41, %42 in 1 : vector<16x2xf32>, vector<16x62xf32> -> vector<16x64xf32>
    %44 = arith.addf %37, %40 : vector<16x64xf32>
    %45 = arith.subf %43, %37 : vector<16x64xf32>
    %46 = vector.shape_cast %19 : vector<1x64xi1> to vector<1x64xi1>
    %47 = vector.broadcast %46 : vector<1x64xi1> to vector<16x64xi1>
    %48 = arith.select %47, %44, %45 : vector<16x64xi1>, vector<16x64xf32>
    %cst_4 = arith.constant 5.000000e-01 : f32
    %49 = vector.broadcast %cst_4 : f32 to vector<16x64xf32>
    %50 = arith.mulf %48, %49 : vector<16x64xf32>
    %c0_5 = arith.constant 0 : index
    %c0_6 = arith.constant 0 : index
    %51 = vector.load %arg2[%c0_5, %c0_6] : memref<16x64xf32, #tpu.memory_space<vmem>>, vector<16x64xf32>
    tpu.vector_store %arg2[%c0_5, %c0_6], %50 {strides = array<i32>} : memref<16x64xf32, #tpu.memory_space<vmem>>, vector<16x64xf32>,
    return
  }
  func.func @transform_0(%arg0: i32) -> (i32, i32) {
    %c0_i32 = arith.constant 0 : i32
    %c0_i32_0 = arith.constant 0 : i32
    return %arg0, %c0_i32 : i32, i32
  }
  func.func @transform_1(%arg0: i32) -> (i32, i32) {
    %c0_i32 = arith.constant 0 : i32
    %c0_i32_0 = arith.constant 0 : i32
    return %arg0, %c0_i32 : i32, i32
  }
}

</mosaic_0001>

<bundles_post_ra>
// kernel: _nsolt_atom_extension_2d.1
= control target key start
LH: loop header
LB: loop body
LE: loop exit
PB: predicated region body
PF: predicated region fallthrough
CT: control target
= control target key end

     0   :  { %s139_s8 = smov 62   ;;  %s140_s9 = smov 126   ;;  %v10_v4 = vlaneseq  ;;  %vm40_vm0 = vcmask 506880   ;;  %vm55_vm1 = vcmask 15360   ;;  %vm80_vm3 = vcmask 31744   ;;  %s206_s0 = inlined_call_operand.vmem [shape: f32[16,64], index: 0, kind: input, shape index: {}]   ;;  %s207_s1 = inlined_call_operand.vmem [shape: f32[16,64], index: 1, kind: output, shape index: {}]  }
   0x1   :  { %v8_v0 = vld [vmem:[%s206_s0] sm:$0xff]  ;;  %v9_v1 = vld [vmem:[%s206_s0 + $0x8] sm:$0xff]  ;;  %s141_s12 = smov 66   ;;  %s142_s13 = smov 2   ;;  %vm145_vm4 = vmmov 1   ;;  %vm125_vm6 = vcmask 523264  }
   0x2   :  { %34 = vrot.lane.b32.xlu1 %v8_v0, %s139_s8  ;;  %28 = vrot.lane.b32.xlu0 %v8_v0, %s140_s9  ;;  %v11_v7 = vand.u32 127, %v10_v4  ;;  %s143_s0 = smov 68   ;;  %s144_s14 = smov 4  }
   0x4   :  { %v16_v10 = vand.u32 3, %v11_v7 }
   0x6   :  { %36 = vrot.lane.b32.xlu1 %v9_v1, %s139_s8  ;;  %30 = vrot.lane.b32.xlu0 %v9_v1, %s140_s9  ;;  %vm174_vm2 = vcmp.lt.s32.totalorder %v16_v10, 2 }
   0x7   :  { %vm25_vm5 = vmxor %vm174_vm2, %vm145_vm4 }
   0xa   :  { %45 = vrot.lane.b32.xlu1 %v9_v1, %s141_s12  ;;  %43 = vrot.lane.b32.xlu0 %v8_v0, %s141_s12 }
   0xe   :  { %51 = vrot.lane.b32.xlu1 %v9_v1, %s142_s13  ;;  %49 = vrot.lane.b32.xlu0 %v8_v0, %s142_s13 }
  0x74   :  { %v35_v2 = vpop.permute.xlu1 %34  ;;  %v29_v3 = vpop.permute.xlu0 %28 }
  0x75   :  { %v41_v11 = vsel %vm40_vm0, %v29_v3, %v35_v2 }
  0x76   :  { %v58_v18 = vadd.f32 %v41_v11, %v8_v0 }
  0x78   :  { %v37_v5 = vpop.permute.xlu1 %36  ;;  %v31_v6 = vpop.permute.xlu0 %30 }
  0x79   :  { %v42_v12 = vsel %vm40_vm0, %v31_v6, %v37_v5 }
  0x7a   :  { %v59_v19 = vadd.f32 %v42_v12, %v9_v1 }
  0x7c   :  { %v46_v8 = vpop.permute.xlu1 %45  ;;  %v44_v9 = vpop.permute.xlu0 %43 }
  0x80   :  { %v52_v13 = vpop.permute.xlu1 %51  ;;  %v50_v14 = vpop.permute.xlu0 %49 }
  0x81   :  { %v57_v15 = vsel %vm55_vm1, %v46_v8, %v52_v13  ;;  %v56_v16 = vsel %vm55_vm1, %v44_v9, %v50_v14 }
  0x82   :  { %v61_v20 = vsub.f32 %v57_v15, %v9_v1  ;;  %v60_v21 = vsub.f32 %v56_v16, %v8_v0 }
  0x84   :  { %v65_v22 = vsel %vm174_vm2, %v59_v19, %v61_v20  ;;  %v64_v23 = vsel %vm174_vm2, %v58_v18, %v60_v21 }
  0x85   :  { %70 = vrot.lane.b32.xlu1 %v65_v22, %s143_s0  ;;  %68 = vrot.lane.b32.xlu0 %v64_v23, %s143_s0 }
  0x89   :  { %76 = vrot.lane.b32.xlu1 %v65_v22, %s144_s14  ;;  %74 = vrot.lane.b32.xlu0 %v64_v23, %s144_s14 }
  0xf7   :  { %v71_v24 = vpop.permute.xlu1 %70  ;;  %v69_v25 = vpop.permute.xlu0 %68 }
  0xfb   :  { %v77_v26 = vpop.permute.xlu1 %76  ;;  %v75_v27 = vpop.permute.xlu0 %74 }
  0xfc   :  { %v82_v28 = vsel %vm80_vm3, %v71_v24, %v77_v26  ;;  %v81_v29 = vsel %vm80_vm3, %v69_v25, %v75_v27 }
  0xfd   :  { %v86_v30 = vsel %vm25_vm5, %v82_v28, %v65_v22  ;;  %v85_v31 = vsel %vm25_vm5, %v81_v29, %v64_v23 }
  0xfe   :  { %91 = vrot.lane.b32.xlu1 %v86_v30, %s140_s9  ;;  %89 = vrot.lane.b32.xlu0 %v85_v31, %s140_s9 }
 0x102   :  { %97 = vrot.lane.b32.xlu1 %v86_v30, %s139_s8  ;;  %95 = vrot.lane.b32.xlu0 %v85_v31, %s139_s8 }
 0x106   :  { %105 = vrot.lane.b32.xlu1 %v86_v30, %s141_s12  ;;  %103 = vrot.lane.b32.xlu0 %v85_v31, %s141_s12 }
 0x10a   :  { %111 = vrot.lane.b32.xlu1 %v86_v30, %s142_s13  ;;  %109 = vrot.lane.b32.xlu0 %v85_v31, %s142_s13 }
 0x170   :  { %v92_v32 = vpop.permute.xlu1 %91  ;;  %v90_v33 = vpop.permute.xlu0 %89 }
 0x174   :  { %v98_v34 = vpop.permute.xlu1 %97  ;;  %v96_v35 = vpop.permute.xlu0 %95 }
 0x175   :  { %v102_v38 = vsel %vm40_vm0, %v92_v32, %v98_v34  ;;  %v101_v39 = vsel %vm40_vm0, %v90_v33, %v96_v35 }
 0x176   :  { %v118_v44 = vadd.f32 %v102_v38, %v86_v30  ;;  %v117_v45 = vadd.f32 %v101_v39, %v85_v31 }
 0x178   :  { %v106_v36 = vpop.permute.xlu1 %105  ;;  %v104_v37 = vpop.permute.xlu0 %103 }
 0x17c   :  { %v112_v40 = vpop.permute.xlu1 %111  ;;  %v110_v41 = vpop.permute.xlu0 %109 }
 0x17d   :  { %v116_v42 = vsel %vm55_vm1, %v106_v36, %v112_v40  ;;  %v115_v43 = vsel %vm55_vm1, %v104_v37, %v110_v41 }
 0x17e   :  { %v120_v46 = vsub.f32 %v116_v42, %v86_v30  ;;  %v119_v47 = vsub.f32 %v115_v43, %v85_v31 }
 0x180   :  { %v122_v48 = vsel %vm174_vm2, %v118_v44, %v120_v46  ;;  %v121_v49 = vsel %vm174_vm2, %v117_v45, %v119_v47 }
 0x181   :  { %v124_v50 = vmul.f32 0.5, %v122_v48  ;;  %v123_v51 = vmul.f32 0.5, %v121_v49 }
 0x183   :  { %127 = vst.msk [vmem:[%s207_s1 + $0x8] sm:$0xff] %vm125_vm6, %v124_v50  ;;  %126 = vst.msk [vmem:[%s207_s1] sm:$0xff] %vm125_vm6, %v123_v51 }

</bundles_post_ra>
